<compile_context>
chip_gen: v6e
topology: v6e:2x2x1
jax: 0.10.0
libtpu: 0.0.40
codegen_flags: <defaults>
</compile_context>

<pallas_src>
import jax
import jax.numpy as jnp
from jax.experimental import pallas as pl
from jax.experimental.pallas import tpu as pltpu

_LANE = 128


def _softmax2d_kernel(x_ref, o_ref):
    # x_ref / o_ref: (TILE_ROWS, L_pad) lane-dense VMEM tiles; each row is one
    # (n, c) spatial slab flattened to H*W (plus optional -1e30 lane padding).
    ex = jnp.exp(x_ref[...].astype(jnp.float32))
    denom = jnp.sum(ex, axis=-1, keepdims=True) + 1e-15
    inv = pl.reciprocal(denom, approx=False)      # exact reciprocal per row
    o_ref[...] = (ex * inv).astype(o_ref.dtype)   # VPU multiply only


def _min_sublane(itemsize: int) -> int:
    # Minimum sublane tile per dtype width: (8,128) f32, (16,128) bf16/f16,
    # (32,128) for 1-byte dtypes.
    if itemsize >= 4:
        return 8
    if itemsize == 2:
        return 16
    return 32


def _vmem_limit_bytes() -> int:
    """Generation-aware scoped-VMEM budget.

    v5e / v6e: 128 MiB physical VMEM -> 64 MiB scoped is safe.
    v7x:        64 MiB physical VMEM per TensorCore -> stay at ~44 MiB.
    """
    phys = None
    try:
        info = pltpu.get_tpu_info()
        phys = getattr(info, "vmem_capacity_bytes", None)
    except Exception:
        phys = None
    if phys is None:
        phys = 64 * 1024 * 1024  # conservative (v7x-sized) assumption
    if phys >= 128 * 1024 * 1024:
        return 64 * 1024 * 1024
    return 44 * 1024 * 1024


def softmax_legit_2d(x, *, tile_rows=None):
    """x: (N, C, H, W) -> same shape; softmax over (H, W) per (n, c)."""
    N, C, H, W = x.shape
    R = N * C
    L = H * W
    itemsize = jnp.dtype(x.dtype).itemsize
    min_sub = _min_sublane(itemsize)

    x_flat = x.reshape(R, L)

    # Lane-pad H*W up to a multiple of 128 so output stores are unmasked,
    # full-width vst (biggest single lever for small spatial sizes). Pad
    # value is a large negative so exp(pad) == 0 and row sums are unchanged.
    L_pad = ((L + _LANE - 1) // _LANE) * _LANE
    if L_pad != L:
        x_flat = jnp.pad(x_flat, ((0, 0), (0, L_pad - L)),
                         constant_values=-1e30)

    vmem_limit = _vmem_limit_bytes()

    if tile_rows is None:
        # Per-grid-step VMEM ~= 2*in + 2*out double buffers + f32 temporaries
        #   ~= tile_rows * L_pad * (4*itemsize + ~8) bytes.
        # Target a single tile of ~6 MiB (measured ~86-90% of HBM roofline at
        # 2-4+ MiB tiles) while leaving ~25% headroom in the scoped budget.
        per_row_total = L_pad * (4 * itemsize + 8)
        rows_from_budget = max(1, (vmem_limit * 3 // 4) // per_row_total)
        rows_from_tile_target = max(1, (6 * 1024 * 1024) // (L_pad * itemsize))
        tile_rows = min(rows_from_budget, rows_from_tile_target)
    tile_rows = max(1, int(tile_rows))

    # Keep >= ~4 grid steps when R allows sublane-aligned splitting, so the
    # DMA pipeline overlaps with compute and v7x's two TensorCores both work.
    if R >= 4 * min_sub:
        tile_rows = min(tile_rows, pl.cdiv(R, 4))

    if tile_rows >= R:
        tile_rows = R                                       # full dim: always legal
    else:
        tile_rows = max(min_sub, (tile_rows // min_sub) * min_sub)
        tile_rows = min(tile_rows, R)

    grid = (pl.cdiv(R, tile_rows),)

    cost = pl.CostEstimate(
        flops=2 * R * L_pad,
        transcendentals=R * L_pad + R,
        bytes_accessed=2 * R * L_pad * itemsize,
    )

    out_flat = pl.pallas_call(
        _softmax2d_kernel,
        out_shape=jax.ShapeDtypeStruct((R, L_pad), x.dtype),
        grid_spec=pltpu.PrefetchScalarGridSpec(
            num_scalar_prefetch=0,
            grid=grid,
            in_specs=[pl.BlockSpec((tile_rows, L_pad), lambda i: (i, 0))],
            out_specs=pl.BlockSpec((tile_rows, L_pad), lambda i: (i, 0)),
        ),
        compiler_params=pltpu.CompilerParams(
            dimension_semantics=("parallel",),
            vmem_limit_bytes=vmem_limit,
        ),
        cost_estimate=cost,
    )(x_flat)

    if L_pad != L:
        out_flat = out_flat[:, :L]
    return out_flat.reshape(N, C, H, W)


def _reference(x):
    ex = jnp.exp(x)
    s = jnp.sum(ex, axis=(2, 3), keepdims=True)
    return ex / (s + 1e-15)


if __name__ == "__main__":
    key = jax.random.PRNGKey(0)
    x = jax.random.normal(key, (2, 4, 16, 16), dtype=jnp.float32)

    out = softmax_legit_2d(x)
    out = jax.block_until_ready(out)

    ref = _reference(x)
    assert out.shape == x.shape
    assert jnp.allclose(out, ref, atol=1e-6, rtol=1e-6)

    print("KERNEL_OK")
</pallas_src>

<mosaic_0001>
module attributes {stable_mosaic.version = 11 : i64} {
  func.func @_softmax2d_kernel(%arg0: i32, %arg1: memref<8x256xf32, #tpu.memory_space<vmem>>, %arg2: memref<8x256xf32, #tpu.memory_space<vmem>>) attributes {dimension_semantics = [#tpu.dimension_semantics<parallel>], iteration_bounds = array<i64: 1>, scalar_prefetch = 0 : i64, scratch_operands = 0 : i64, tpu.core_type = #tpu.core_type<tc>, window_params = [{transform_indices = @transform_0, window_bounds = array<i64: 8, 256>}, {transform_indices = @transform_1, window_bounds = array<i64: 8, 256>}]} {
    %c0 = arith.constant 0 : index
    %c0_0 = arith.constant 0 : index
    %0 = vector.load %arg1[%c0, %c0_0] : memref<8x256xf32, #tpu.memory_space<vmem>>, vector<8x256xf32>
    %1 = math.exp %0 : vector<8x256xf32>
    %cst = arith.constant dense<0.000000e+00> : vector<8xf32>
    %2 = vector.multi_reduction <add>, %1, %cst [1] : vector<8x256xf32> to vector<8xf32>
    %3 = vector.shape_cast %2 : vector<8xf32> to vector<8x1xf32>
    %cst_1 = arith.constant 1.000000e-15 : f32
    %4 = vector.broadcast %cst_1 : f32 to vector<8x1xf32>
    %5 = arith.addf %3, %4 : vector<8x1xf32>
    %6 = tpu.reciprocal %5 : vector<8x1xf32> -> vector<8x1xf32>
    %7 = vector.broadcast %6 : vector<8x1xf32> to vector<8x256xf32>
    %8 = arith.mulf %1, %7 : vector<8x256xf32>
    %c0_2 = arith.constant 0 : index
    %c0_3 = arith.constant 0 : index
    %9 = vector.load %arg2[%c0_2, %c0_3] : memref<8x256xf32, #tpu.memory_space<vmem>>, vector<8x256xf32>
    tpu.vector_store %arg2[%c0_2, %c0_3], %8 {strides = array<i32>} : memref<8x256xf32, #tpu.memory_space<vmem>>, vector<8x256xf32>,
    return
  }
  func.func @transform_0(%arg0: i32) -> (i32, i32) {
    %c0_i32 = arith.constant 0 : i32
    %c0_i32_0 = arith.constant 0 : i32
    return %arg0, %c0_i32 : i32, i32
  }
  func.func @transform_1(%arg0: i32) -> (i32, i32) {
    %c0_i32 = arith.constant 0 : i32
    %c0_i32_0 = arith.constant 0 : i32
    return %arg0, %c0_i32 : i32, i32
  }
}

</mosaic_0001>

<bundles_post_ra>
// kernel: tpu_custom_call.1
= control target key start
LH: loop header
LB: loop body
LE: loop exit
PB: predicated region body
PF: predicated region fallthrough
CT: control target
= control target key end

     0   :  { %6 = vsyncpa [#allocation3], 0  ;;  %s121_s0 = inlined_call_operand.hbm [shape: f32[8,256], index: 0, kind: input, shape index: {}]   ;;  %s122_s1 = inlined_call_operand.hbm [shape: f32[8,256], index: 1, kind: output, shape index: {}]  }
   0x1   :  { %7 = vsyncpa [#allocation4], 0  ;;  %s103_s6 = smov [#allocation2]  }
   0x2   :  { %s14_s7 = sshll.u32 %s103_s6, 4  ;;  %s15_s7 = int_to_ptr.vmem [resolvable:$true] %s14_s7 }
   0x3   :  { %s67_s8 = scalar_lea.vmem %s15_s7, 256  ;;  %p72_p1 = scmp.lt.s32.totalorder %s15_s7, %s15_s7 }
   0x4   :  { %p68_p0 = scmp.ne.s32.totalorder %s15_s7, %s67_s8  ;;  %p73_p2 = scmp.lt.s32.totalorder %s67_s8, %s67_s8 }
   0x6   :  { %p74_p3 = por %p73_p2, %p72_p1 }
   0x8   :  { %p75_p4 = pnand %p74_p3, %p68_p0 }
   0xa   :  { %78 = shalt.err (!%p75_p4)
}
   0xb   :  { %17 = dma.hbm_to_vmem [thread:$0]  %s121_s0, 256, %s15_s7, [#allocation3]  }
   0xc   :  { %99 = dma.done.wait [#allocation3], 256  }
   0xd   :  { %100 = vsyncadd [#allocation3], 4294967040  ;;  %v21_v0 = vld [vmem:[#allocation2] sm:$0xff]  ;;  %v22_v1 = vld [vmem:[#allocation2 + $0x8] sm:$0xff]  ;;  %s104_s11 = smov [#allocation5]  }
   0xe   :  { %v23_v2 = vmul.f32 1.442695, %v21_v0  ;;  %v25_v3 = vmul.f32 1.442695, %v22_v1  ;;  %s42_s12 = sshll.u32 %s104_s11, 4  ;;  %s43_s12 = int_to_ptr.vmem [resolvable:$true] %s42_s12 }
   0xf   :  { %s79_s0 = scalar_lea.vmem %s43_s12, 256  ;;  %p84_p6 = scmp.lt.s32.totalorder %s43_s12, %s43_s12 }
  0x10   :  { %53 = vpow2.f32 %v23_v2  ;;  %p80_p5 = scmp.ne.s32.totalorder %s43_s12, %s79_s0  ;;  %p85_p7 = scmp.lt.s32.totalorder %s79_s0, %s79_s0 }
  0x11   :  { %55 = vpow2.f32 %v25_v3 }
  0x12   :  { %p86_p8 = por %p85_p7, %p84_p6 }
  0x14   :  { %p87_p9 = pnand %p86_p8, %p80_p5 }
  0x1d   :  { %v54_v4 = vpop.eup %53 }
  0x1e   :  { %v56_v5 = vpop.eup %55 }
  0x1f   :  { %v27_v6 = vadd.f32 %v56_v5, %v54_v4 }
  0x21   :  { %28 = vadd.xlane.f32.xlu0 %v27_v6 }
  0xaa   :  { %v29_v7 = vpop.xlane.xlu0 %28 }
  0xab   :  { %v30_v8 = vadd.f32 1e-15, %v29_v7 }
  0xad   :  { %57 = vrcp.f32 %v30_v8 }
  0xba   :  { %v58_v9 = vpop.eup %57 }
  0xbb   :  { %v32_v10 = vmul.f32 %v58_v9, %v54_v4  ;;  %v33_v11 = vmul.f32 %v58_v9, %v56_v5 }
  0xbd   :  { %34 = vst [vmem:[#allocation5] sm:$0xff] %v32_v10  ;;  %35 = vst [vmem:[#allocation5 + $0x8] sm:$0xff] %v33_v11 }
  0xbe   :  { %90 = shalt.err (!%p87_p9)
}
  0xbf   :  { %45 = dma.vmem_to_hbm [thread:$0]  %s43_s12, 256, %s122_s1, [#allocation4]  }
  0xc0   :  { %101 = dma.done.wait [#allocation4], 256  }
  0xc1   :  { %102 = vsyncadd [#allocation4], 4294967040 }
  0xc2   :  { %49 = vsyncpa [#allocation3], 1 }
  0xc3   :  { %50 = vsyncpa [#allocation4], 1 }

</bundles_post_ra>
